<compile_context>
chip_gen: v6e
topology: v6e:2x2x1
jax: 0.10.0
libtpu: 0.0.40
codegen_flags: <defaults>
</compile_context>

<pallas_src>
import jax
import jax.numpy as jnp
from jax.experimental import pallas as pl
from jax.experimental.pallas import tpu as pltpu

LANES = 128
TILE_ROW_CAP = 4096  # 4096 x 128 x 4 B = 2 MiB per f32 tile


def _round_up(n: int, m: int) -> int:
    return ((n + m - 1) // m) * m


def _epsilon_fill_kernel(eps_ref, o_ref):
    # eps_ref: (1,) float32 scalar in SMEM
    # o_ref:   (tile_rows, LANES) lane-dense output tile in VMEM
    # Pure broadcast + unmasked store; the writeback DMA is the only real cost.
    o_ref[...] = jnp.full(o_ref.shape, eps_ref[0], o_ref.dtype)


def epsilon_layer(x, epsilon):
    """epsilon * ones_like(x[:, 0:1]) computed with a Pallas fill kernel.

    Args:
      x:       [B, D] array (only its batch size and dtype matter).
      epsilon: [1, 1] parameter array.
    Returns:
      [B, 1] array filled with epsilon (dtype follows torch promotion of
      epsilon.dtype with x.dtype).
    """
    B = x.shape[0]
    out_dtype = jnp.result_type(epsilon.dtype, x.dtype)
    itemsize = jnp.dtype(out_dtype).itemsize

    if B == 0:
        return jnp.zeros((0, 1), out_dtype)

    # Lane-dense slab: rows x 128 lanes (full unmasked vst), tiled over a 1-D grid.
    pack = max(8, 32 // itemsize)          # sublane packing: 8 f32, 16 bf16, 32 i8
    rows_needed = pl.cdiv(B, LANES)

    # Aim for >= 2 grid steps when there is enough work so v7x's two
    # TensorCores can share the fill; cap the tile at TILE_ROW_CAP rows.
    target_rows = pl.cdiv(rows_needed, 2) if rows_needed > 2 * pack else rows_needed
    tile_rows = min(TILE_ROW_CAP, _round_up(target_rows, pack))
    grid_steps = pl.cdiv(rows_needed, tile_rows)
    padded_rows = grid_steps * tile_rows

    # 32-bit scalar into SMEM; the cast to out_dtype happens inside the kernel.
    eps_scalar = epsilon.reshape(-1)[:1].astype(jnp.float32)

    slab = pl.pallas_call(
        _epsilon_fill_kernel,
        out_shape=jax.ShapeDtypeStruct((padded_rows, LANES), out_dtype),
        grid=(grid_steps,),
        in_specs=[pl.BlockSpec(memory_space=pltpu.MemorySpace.SMEM)],
        out_specs=pl.BlockSpec((tile_rows, LANES), lambda i: (i, 0)),
        compiler_params=pltpu.CompilerParams(
            # Shards across TensorCores on v7x; on single-TC v5e/v6e the grid
            # is simply a sequential loop (parallel-vs-arbitrary delta ~ 0).
            dimension_semantics=("parallel",),
        ),
        cost_estimate=pl.CostEstimate(
            flops=0,
            transcendentals=0,
            bytes_accessed=padded_rows * LANES * itemsize + 4,
        ),
    )(eps_scalar)

    if padded_rows * LANES == B:
        # Row-major (padded_rows, 128) -> (B, 1) preserves the linear layout:
        # pure metadata reshape, no copy.
        return slab.reshape(B, 1)

    # Slab is padded past B: XLA materializes this slice as a real copy
    # (read slab + write (B,1)). Tolerable for the tiny (B,1) output; the
    # long-term fix is fusion into the consumer (see TODO at top).
    return slab.reshape(padded_rows * LANES)[:B].reshape(B, 1)


if __name__ == "__main__":
    key = jax.random.PRNGKey(0)
    k_eps, k_x = jax.random.split(key)

    # Deterministic parameter init mirroring torch.abs(torch.randn([1, 1]))
    epsilon = jnp.abs(jax.random.normal(k_eps, (1, 1), dtype=jnp.float32))

    # Two small cases: B=2 exercises the generic (sliced) path, B=1024 hits
    # the exact zero-copy reshape path (B == padded_rows * 128).
    for B, D in [(2, 32), (1024, 32)]:
        x = jax.random.normal(jax.random.fold_in(k_x, B), (B, D), dtype=jnp.float32)

        out = jax.block_until_ready(epsilon_layer(x, epsilon))

        # Reference in plain JAX (matches the PyTorch forward)
        ref = epsilon * jnp.ones_like(x[:, 0:1])
        assert out.shape == (B, 1), (B, out.shape)
        assert out.dtype == ref.dtype, (out.dtype, ref.dtype)
        assert jnp.allclose(out, ref), (B, out[:4], ref[:4])

    print("KERNEL_OK")
</pallas_src>

<mosaic_0001>
module attributes {stable_mosaic.version = 11 : i64} {
  func.func @_epsilon_fill_kernel(%arg0: i32, %arg1: memref<1xf32, #tpu.memory_space<smem>>, %arg2: memref<8x128xf32, #tpu.memory_space<vmem>>) attributes {dimension_semantics = [#tpu.dimension_semantics<parallel>], iteration_bounds = array<i64: 1>, scalar_prefetch = 0 : i64, scratch_operands = 0 : i64, tpu.core_type = #tpu.core_type<tc>, window_params = [{transform_indices = @transform_0, window_bounds = array<i64: 1>}, {transform_indices = @transform_1, window_bounds = array<i64: 8, 128>}]} {
    %c0 = arith.constant 0 : index
    %0 = memref.load %arg1[%c0] : memref<1xf32, #tpu.memory_space<smem>>
    %1 = vector.broadcast %0 : f32 to vector<8x128xf32>
    %c0_0 = arith.constant 0 : index
    %c0_1 = arith.constant 0 : index
    %2 = vector.load %arg2[%c0_0, %c0_1] : memref<8x128xf32, #tpu.memory_space<vmem>>, vector<8x128xf32>
    tpu.vector_store %arg2[%c0_0, %c0_1], %1 {strides = array<i32>} : memref<8x128xf32, #tpu.memory_space<vmem>>, vector<8x128xf32>,
    return
  }
  func.func @transform_0(%arg0: i32) -> i32 {
    %c0_i32 = arith.constant 0 : i32
    %c0_i32_0 = arith.constant 0 : i32
    return %c0_i32 : i32
  }
  func.func @transform_1(%arg0: i32) -> (i32, i32) {
    %c0_i32 = arith.constant 0 : i32
    %c0_i32_0 = arith.constant 0 : i32
    return %arg0, %c0_i32 : i32, i32
  }
}

</mosaic_0001>

<bundles_post_ra>
// kernel: tpu_custom_call.1
= control target key start
LH: loop header
LB: loop body
LE: loop exit
PB: predicated region body
PF: predicated region fallthrough
CT: control target
= control target key end

     0   :  { %s67_s0 = inlined_call_operand.<no memory space> [shape: f32[1], index: 0, kind: input, shape index: {}]   ;;  %s68_s1 = inlined_call_operand.hbm [shape: f32[8,128], index: 1, kind: output, shape index: {}]  }
   0x1   :  { %v11_v0 = vstv %s67_s0 }
   0x2   :  { %7 = vsyncpa [#allocation4], 0  ;;  %12 = vst [vmem:[#allocation3] sm:$0xff] %v11_v0  ;;  %s50_s8 = smov [#allocation3]  }
   0x3   :  { %s19_s9 = sshll.u32 %s50_s8, 4  ;;  %s20_s9 = int_to_ptr.vmem [resolvable:$true] %s19_s9 }
   0x4   :  { %s28_s10 = scalar_lea.vmem %s20_s9, 128  ;;  %p33_p1 = scmp.lt.s32.totalorder %s20_s9, %s20_s9 }
   0x5   :  { %p29_p0 = scmp.ne.s32.totalorder %s20_s9, %s28_s10  ;;  %p34_p2 = scmp.lt.s32.totalorder %s28_s10, %s28_s10 }
   0x7   :  { %p35_p3 = por %p34_p2, %p33_p1 }
   0x9   :  { %p36_p4 = pnand %p35_p3, %p29_p0 }
   0xb   :  { %39 = shalt.err (!%p36_p4)
}
   0xc   :  { %22 = dma.vmem_to_hbm [thread:$0]  %s20_s9, 128, %s68_s1, [#allocation4]  }
   0xd   :  { %48 = dma.done.wait [#allocation4], 128  }
   0xe   :  { %49 = vsyncadd [#allocation4], 4294967168 }
   0xf   :  { %26 = vsyncpa [#allocation4], 1 }

</bundles_post_ra>
